<compile_context>
chip_gen: v6e
topology: v6e:2x2x1
jax: 0.10.0
libtpu: 0.0.40
codegen_flags: <defaults>
</compile_context>

<pallas_src>
import functools

import jax
import jax.numpy as jnp
from jax.experimental import pallas as pl
from jax.experimental.pallas import tpu as pltpu


def _normalize_kernel(x_ref, o_ref, *, mean_zero: bool):
    # One multiply (plus optional subtract) per element; cast happens in VMEM.
    y = x_ref[...].astype(jnp.float32) * jnp.float32(1.0 / 255.0)
    if mean_zero:
        y = y - jnp.float32(0.5)
    o_ref[...] = y.astype(o_ref.dtype)


def _round_up(v: int, m: int) -> int:
    return ((v + m - 1) // m) * m


def normalize_img(x, mean_zero: bool = False, *, out_dtype=jnp.float32,
                  row_tile: int = 8192):
    """Pallas equivalent of NormalizeImg.forward.

    Elementwise x / 255.0 (optionally - 0.5) for any shape / dtype (e.g. NCHW
    uint8 or float32).  Returns `out_dtype` (float32 default, matching the
    PyTorch module; bf16 halves output HBM traffic if acceptable downstream).
    """
    orig_shape = x.shape
    n = x.size
    LANES = 128
    SUB = 32                    # second-minor alignment, safe for >= int8 dtypes
    MIN_STEPS = 8               # aim for >= 8 grid steps on mid/large inputs
    MIN_BLOCK_ELEMS = 64 * 1024            # ~256 KiB f32 per-block floor
    MAX_BLOCK_ELEMS = row_tile * LANES     # ~4 MiB f32 per-block cap (default)

    if n == 0:
        return jnp.zeros(orig_shape, out_dtype)

    # Copy-free 2-D view of the contiguous input:
    #  * n % 128 == 0 -> lane-dense (n/128, 128) view (common case).
    #  * otherwise    -> collapse leading dims: (prod(shape[:-1]), last_dim),
    #    full-extent last dim (no pad / slice copies; lane-masked stores).
    if n % LANES == 0:
        rows, cols = n // LANES, LANES
    elif x.ndim >= 1:
        cols = orig_shape[-1]
        rows = n // cols
    else:
        rows, cols = 1, 1
    x2d = x.reshape(rows, cols)

    # Block-row choice: multiple of 32 (or full extent), clamped between a
    # ~256 KiB floor and a ~4 MiB cap, targeting >= MIN_STEPS grid steps.
    if rows <= SUB:
        block_rows = rows                                   # full extent
    else:
        floor_r = _round_up(max(1, MIN_BLOCK_ELEMS // cols), SUB)
        cap_r = max(SUB, (MAX_BLOCK_ELEMS // max(cols, 1)) // SUB * SUB)
        tgt_r = _round_up(-(-rows // MIN_STEPS), SUB)
        block_rows = min(rows, min(cap_r, max(floor_r, tgt_r)))

    grid = (pl.cdiv(rows, block_rows),)

    # Need-based scoped-VMEM limit: double-buffered in + out, with headroom.
    in_bytes = max(1, jnp.dtype(x.dtype).itemsize)
    out_bytes = jnp.dtype(out_dtype).itemsize
    rows_p = _round_up(block_rows, SUB)
    cols_p = _round_up(cols, LANES)
    vmem_need = 2 * rows_p * cols_p * (in_bytes + out_bytes)
    vmem_limit = int(min(max(vmem_need + (8 << 20), 32 << 20), 56 << 20))

    kernel = functools.partial(_normalize_kernel, mean_zero=mean_zero)

    out2d = pl.pallas_call(
        kernel,
        out_shape=jax.ShapeDtypeStruct((rows, cols), out_dtype),
        grid_spec=pltpu.PrefetchScalarGridSpec(
            num_scalar_prefetch=0,
            grid=grid,
            in_specs=[pl.BlockSpec((block_rows, cols), lambda i: (i, 0))],
            out_specs=pl.BlockSpec((block_rows, cols), lambda i: (i, 0)),
        ),
        compiler_params=pltpu.CompilerParams(
            dimension_semantics=("parallel",),
            vmem_limit_bytes=vmem_limit,
        ),
    )(x2d)

    # TODO(synk): a masked final block could also make the ragged-cols path
    # lane-dense; left as the simple full-extent-last-dim view for now.
    return out2d.reshape(orig_shape)


if __name__ == "__main__":
    key = jax.random.PRNGKey(0)
    TOL = 3e-7  # multiply-by-reciprocal differs from x/255.0 by <= 1 ulp

    # NCHW float input in [0, 255] (as the PyTorch module would receive).
    x = jax.random.uniform(key, (2, 4, 16, 16), dtype=jnp.float32) * 255.0

    # mean_zero=False path.
    y = jax.block_until_ready(normalize_img(x, mean_zero=False))
    assert y.shape == x.shape and y.dtype == jnp.float32
    assert jnp.allclose(y, x / 255.0, atol=TOL), "mismatch (mean_zero=False)"

    # mean_zero=True path.
    y2 = jax.block_until_ready(normalize_img(x, mean_zero=True))
    assert jnp.allclose(y2, x / 255.0 - 0.5, atol=TOL), "mismatch (mean_zero=True)"

    # Native uint8 input: no wrapper cast — the kernel casts in VMEM.
    k1, k2 = jax.random.split(key)
    xu8 = jax.random.randint(k1, (2, 4, 16, 16), 0, 256, dtype=jnp.int32).astype(jnp.uint8)
    yu8 = jax.block_until_ready(normalize_img(xu8, mean_zero=False))
    assert jnp.allclose(yu8, xu8.astype(jnp.float32) / 255.0, atol=TOL), \
        "mismatch (uint8 input)"

    # Ragged total size (n % 128 != 0): copy-free (rows, last_dim) path.
    xr = jax.random.uniform(k2, (2, 3, 5, 7), dtype=jnp.float32) * 255.0
    yr = jax.block_until_ready(normalize_img(xr, mean_zero=True))
    assert yr.shape == xr.shape
    assert jnp.allclose(yr, xr / 255.0 - 0.5, atol=TOL), "mismatch (ragged shape)"

    # Larger uint8 input that exercises a multi-step grid (overlapped DMA).
    xb = jax.random.randint(key, (8, 4, 64, 64), 0, 256, dtype=jnp.int32).astype(jnp.uint8)
    yb = jax.block_until_ready(normalize_img(xb, mean_zero=False))
    assert jnp.allclose(yb, xb.astype(jnp.float32) / 255.0, atol=TOL), \
        "mismatch (multi-block uint8)"

    print("KERNEL_OK")
</pallas_src>

<mosaic_0001>
module attributes {stable_mosaic.version = 11 : i64} {
  func.func @_normalize_kernel(%arg0: i32, %arg1: memref<16x128xf32, #tpu.memory_space<vmem>>, %arg2: memref<16x128xf32, #tpu.memory_space<vmem>>) attributes {dimension_semantics = [#tpu.dimension_semantics<parallel>], iteration_bounds = array<i64: 1>, scalar_prefetch = 0 : i64, scratch_operands = 0 : i64, tpu.core_type = #tpu.core_type<tc>, window_params = [{transform_indices = @transform_0, window_bounds = array<i64: 16, 128>}, {transform_indices = @transform_1, window_bounds = array<i64: 16, 128>}]} {
    %c0 = arith.constant 0 : index
    %c0_0 = arith.constant 0 : index
    %0 = vector.load %arg1[%c0, %c0_0] : memref<16x128xf32, #tpu.memory_space<vmem>>, vector<16x128xf32>
    %cst = arith.constant 0.00392156886 : f32
    %1 = vector.broadcast %cst : f32 to vector<16x128xf32>
    %2 = arith.mulf %0, %1 : vector<16x128xf32>
    %c0_1 = arith.constant 0 : index
    %c0_2 = arith.constant 0 : index
    %3 = vector.load %arg2[%c0_1, %c0_2] : memref<16x128xf32, #tpu.memory_space<vmem>>, vector<16x128xf32>
    tpu.vector_store %arg2[%c0_1, %c0_2], %2 {strides = array<i32>} : memref<16x128xf32, #tpu.memory_space<vmem>>, vector<16x128xf32>,
    return
  }
  func.func @transform_0(%arg0: i32) -> (i32, i32) {
    %c0_i32 = arith.constant 0 : i32
    %c0_i32_0 = arith.constant 0 : i32
    return %arg0, %c0_i32 : i32, i32
  }
  func.func @transform_1(%arg0: i32) -> (i32, i32) {
    %c0_i32 = arith.constant 0 : i32
    %c0_i32_0 = arith.constant 0 : i32
    return %arg0, %c0_i32 : i32, i32
  }
}

</mosaic_0001>

<bundles_post_ra>
// kernel: tpu_custom_call.1
= control target key start
LH: loop header
LB: loop body
LE: loop exit
PB: predicated region body
PF: predicated region fallthrough
CT: control target
= control target key end

     0   :  { %6 = vsyncpa [#allocation3], 0  ;;  %s114_s0 = inlined_call_operand.hbm [shape: f32[16,128], index: 0, kind: input, shape index: {}]   ;;  %s115_s1 = inlined_call_operand.hbm [shape: f32[16,128], index: 1, kind: output, shape index: {}]  }
   0x1   :  { %7 = vsyncpa [#allocation4], 0  ;;  %s94_s6 = smov [#allocation2]  }
   0x2   :  { %s13_s7 = sshll.u32 %s94_s6, 4  ;;  %s14_s7 = int_to_ptr.vmem [resolvable:$true] %s13_s7 }
   0x3   :  { %s58_s8 = scalar_lea.vmem %s14_s7, 256  ;;  %p63_p1 = scmp.lt.s32.totalorder %s14_s7, %s14_s7 }
   0x4   :  { %p59_p0 = scmp.ne.s32.totalorder %s14_s7, %s58_s8  ;;  %p64_p2 = scmp.lt.s32.totalorder %s58_s8, %s58_s8 }
   0x6   :  { %p65_p3 = por %p64_p2, %p63_p1 }
   0x8   :  { %p66_p4 = pnand %p65_p3, %p59_p0 }
   0xa   :  { %69 = shalt.err (!%p66_p4)
}
   0xb   :  { %s95_s9 = smov 128   ;;  %s96_s10 = smov 8  }
   0xc   :  { %19 = dma.hbm_to_vmem [thread:$0]  %s114_s0, 256, %s14_s7, [#allocation3], %s95_s9, %s95_s9, %s96_s10  }
   0xd   :  { %90 = dma.done.wait [#allocation3], 256  }
   0xe   :  { %91 = vsyncadd [#allocation3], 4294967040  ;;  %s97_s13 = smov [#allocation5]   ;;  %v23_v0 = vld [vmem:[#allocation2] sm:$0xff]  ;;  %v24_v1 = vld [vmem:[#allocation2 + $0x8] sm:$0xff] }
   0xf   :  { %s34_s14 = sshll.u32 %s97_s13, 4  ;;  %v25_v2 = vmul.f32 0.003921569, %v23_v0  ;;  %v26_v3 = vmul.f32 0.003921569, %v24_v1  ;;  %s35_s14 = int_to_ptr.vmem [resolvable:$true] %s34_s14 }
  0x10   :  { %s70_s15 = scalar_lea.vmem %s35_s14, 256  ;;  %p75_p6 = scmp.lt.s32.totalorder %s35_s14, %s35_s14 }
  0x11   :  { %27 = vst [vmem:[#allocation5] sm:$0xff] %v25_v2  ;;  %28 = vst [vmem:[#allocation5 + $0x8] sm:$0xff] %v26_v3  ;;  %p71_p5 = scmp.ne.s32.totalorder %s35_s14, %s70_s15  ;;  %p76_p7 = scmp.lt.s32.totalorder %s70_s15, %s70_s15 }
  0x13   :  { %p77_p8 = por %p76_p7, %p75_p6 }
  0x15   :  { %p78_p9 = pnand %p77_p8, %p71_p5 }
  0x17   :  { %81 = shalt.err (!%p78_p9)
}
  0x18   :  { %40 = dma.vmem_to_hbm [thread:$0]  %s35_s14, 256, %s115_s1, [#allocation4], %s95_s9, %s95_s9, %s96_s10  }
  0x19   :  { %92 = dma.done.wait [#allocation4], 256  }
  0x1a   :  { %93 = vsyncadd [#allocation4], 4294967040 }
  0x1b   :  { %44 = vsyncpa [#allocation3], 1 }
  0x1c   :  { %45 = vsyncpa [#allocation4], 1 }

</bundles_post_ra>
